<compile_context>
chip_gen: v6e
topology: v6e:2x2x1
jax: 0.10.0
libtpu: 0.0.40
codegen_flags: <defaults>
</compile_context>

<pallas_src>
import numpy as np
import jax
import jax.numpy as jnp
from jax.experimental import pallas as pl
from jax.experimental.pallas import tpu as pltpu

# ----------------------------- config ---------------------------------------
INPUT_DIM = 32       # embedding_dim == input_dim (as implied by the module)
HIDDEN_DIM = 32
VOCAB_SIZE = 16
_SUB = 8             # sublane multiple for level padding


def _sigmoid(x):
    return 1.0 / (1.0 + jnp.exp(-x))


def _pad8(n):
    return max(_SUB, ((n + _SUB - 1) // _SUB) * _SUB)


# ----------------------------- schedule --------------------------------------
class Schedule:
    """Static, host-built bottom-up level schedule for one tree.

    Node state slots are assigned in level-packed order (each level padded to
    a multiple of 8 rows), so per-level state commits are contiguous slices.
    """

    def __init__(self, tree, root):
        level = {}

        def height(n):
            _, children = tree[n]
            level[n] = 0 if not children else 1 + max(height(c) for c in children)
            return level[n]

        height(root)
        n_levels = level[root] + 1
        by_level = [[] for _ in range(n_levels)]
        for n in tree:
            by_level[level[n]].append(n)
        assert by_level[-1] == [root], "root must be the unique top-level node"

        slot = {}
        offset = 0
        labels = []
        packed = []                       # (offset, padded, node_names)
        for lv_nodes in by_level:
            cnt = len(lv_nodes)
            padded = _pad8(cnt)
            for r, n in enumerate(lv_nodes):
                slot[n] = offset + r
            labels.extend(tree[n][0] for n in lv_nodes)
            labels.extend([0] * (padded - cnt))
            packed.append((offset, padded, lv_nodes))
            offset += padded

        # Resolve child slots now that every node has one (children are always
        # at strictly lower levels, i.e. already committed when parent runs).
        self.levels = []
        for off, padded, lv_nodes in packed:
            rows = []
            for n in lv_nodes:
                _, children = tree[n]
                rows.append((tuple(slot[c] for c in children), n == root))
            self.levels.append((off, padded, rows))

        self.labels = np.asarray(labels, np.int32)
        self.n_slots = offset
        self.level_max = max(p for _, p, _ in self.levels)


# ----------------------------- Pallas kernel ---------------------------------
def make_tree_kernel(levels):
    """Build a kernel with the (static) tree schedule baked in."""
    H = HIDDEN_DIM

    def kernel(x_ref, w_ref, u_ref, b_ref, out_ref,
               par_state, c_state, h_lvl, c_lvl):
        # x_ref  : [N_SLOTS, D]   level-packed label embeddings
        # w_ref  : [D, 4H]        columns [W_i | W_o | W_u | W_f] (pre-transposed)
        # u_ref  : [H, 4H]        columns [U_i | U_o | U_u | U_f]
        # b_ref  : [1, 4H]        all four biases folded per gate
        # out_ref: [1, H]         root hidden state
        # par_state: VMEM [N_SLOTS, 4H]  row n = h_n @ [U_iou | U_f]  (no bias)
        # c_state  : VMEM [N_SLOTS, H]   row n = c_n
        # h_lvl/c_lvl: VMEM [LEVEL_MAX, H] staging buffers for the current level
        h_lvl[...] = jnp.zeros_like(h_lvl)
        c_lvl[...] = jnp.zeros_like(c_lvl)
        w = w_ref[...]
        u = u_ref[...]
        b = b_ref[...]

        for off, padded, rows in levels:                       # static unroll
            # x-side matmul for the whole level (128-lane-dense MXU).
            xw = jnp.dot(x_ref[pl.ds(off, padded), :], w,
                         preferred_element_type=jnp.float32) + b       # [Bp, 4H]

            for r, (child_slots, is_root) in enumerate(rows):  # static unroll
                row = xw[r:r + 1, :]                                   # [1, 4H]
                if child_slots:
                    par_rows = [par_state[pl.ds(cs, 1), :] for cs in child_slots]
                    c_rows = [c_state[pl.ds(cs, 1), :] for cs in child_slots]
                    par_sum = par_rows[0]
                    for pr in par_rows[1:]:
                        par_sum = par_sum + pr
                    # iou = W_iou(x)+b_Wiou+b_Uiou + sum_j h_j@U_iou^T
                    iou = row[:, :3 * H] + par_sum[:, :3 * H]
                    fc = jnp.zeros((1, H), jnp.float32)
                    for pr, cr in zip(par_rows, c_rows):        # per-child forget
                        f = _sigmoid(row[:, 3 * H:] + pr[:, 3 * H:])
                        fc = fc + f * cr
                else:                                           # leaf node
                    iou = row[:, :3 * H]
                    fc = jnp.zeros((1, H), jnp.float32)

                i = _sigmoid(iou[:, :H])
                o = _sigmoid(iou[:, H:2 * H])
                g = jnp.tanh(iou[:, 2 * H:])
                c_new = i * g + fc
                h_new = o * jnp.tanh(c_new)
                h_lvl[pl.ds(r, 1), :] = h_new
                c_lvl[pl.ds(r, 1), :] = c_new
                if is_root:
                    out_ref[...] = h_new

            # Commit the level: one batched U matmul, contiguous state writes.
            par_state[pl.ds(off, padded), :] = jnp.dot(
                h_lvl[pl.ds(0, padded), :], u, preferred_element_type=jnp.float32)
            c_state[pl.ds(off, padded), :] = c_lvl[pl.ds(0, padded), :]

    return kernel


def tree_lstm_forward(tree, root, params):
    """tree: dict node_id -> (label_index, [child_ids]). Returns root h [H]."""
    sched = Schedule(tree, root)
    kernel = make_tree_kernel(sched.levels)
    labels = sched.labels

    call = pl.pallas_call(
        kernel,
        out_shape=jax.ShapeDtypeStruct((1, HIDDEN_DIM), jnp.float32),
        scratch_shapes=[
            pltpu.VMEM((sched.n_slots, 4 * HIDDEN_DIM), jnp.float32),   # par_state
            pltpu.VMEM((sched.n_slots, HIDDEN_DIM), jnp.float32),       # c_state
            pltpu.VMEM((sched.level_max, HIDDEN_DIM), jnp.float32),     # h_lvl
            pltpu.VMEM((sched.level_max, HIDDEN_DIM), jnp.float32),     # c_lvl
        ],
    )

    @jax.jit
    def run(emb, w_all, u_all, b_all):
        x_all = jnp.take(emb, jnp.asarray(labels), axis=0)   # one static gather
        return call(x_all, w_all, u_all, b_all)[0]

    return run(params["embedding"], params["w_all"],
               params["u_all"], params["b_all"])


# ----------------------------- parameter setup -------------------------------
def init_params(key, input_dim, hidden_dim, vocab_size):
    ks = jax.random.split(key, 9)
    s = 0.1
    H = hidden_dim
    # torch nn.Linear stores weight as [out, in]; replicate then repack.
    W_iou_w = jax.random.normal(ks[0], (3 * H, input_dim)) * s
    W_iou_b = jax.random.normal(ks[1], (3 * H,)) * s
    U_iou_w = jax.random.normal(ks[2], (3 * H, H)) * s
    U_iou_b = jax.random.normal(ks[3], (3 * H,)) * s
    W_f_w = jax.random.normal(ks[4], (H, input_dim)) * s
    W_f_b = jax.random.normal(ks[5], (H,)) * s
    U_f_w = jax.random.normal(ks[6], (H, H)) * s
    U_f_b = jax.random.normal(ks[7], (H,)) * s
    embedding = jax.random.normal(ks[8], (vocab_size, input_dim)) * s

    # Fused, pre-transposed to [in, out]; column order = [i | o | u | f].
    w_all = jnp.concatenate([W_iou_w.T, W_f_w.T], axis=1)                 # [D, 4H]
    u_all = jnp.concatenate([U_iou_w.T, U_f_w.T], axis=1)                 # [H, 4H]
    b_all = jnp.concatenate([W_iou_b + U_iou_b, W_f_b + U_f_b])[None, :]  # [1, 4H]

    params = {
        "w_all": w_all.astype(jnp.float32),
        "u_all": u_all.astype(jnp.float32),
        "b_all": b_all.astype(jnp.float32),
        "embedding": embedding.astype(jnp.float32),
    }
    raw = dict(W_iou_w=W_iou_w, W_iou_b=W_iou_b, U_iou_w=U_iou_w,
               U_iou_b=U_iou_b, W_f_w=W_f_w, W_f_b=W_f_b,
               U_f_w=U_f_w, U_f_b=U_f_b)
    return params, raw


# ----------------------------- numpy reference --------------------------------
def _reference_forward_np(tree, root, raw, embedding):
    """Direct (unfused) translation of the PyTorch recursion, in numpy."""
    H = HIDDEN_DIM
    raw = {k: np.asarray(v, np.float32) for k, v in raw.items()}
    emb = np.asarray(embedding, np.float32)

    def sig(x):
        return 1.0 / (1.0 + np.exp(-x))

    def cell(x, h_children, c_children):
        h_sum = h_children.sum(axis=0)
        iou = (x @ raw["W_iou_w"].T + raw["W_iou_b"]
               + h_sum @ raw["U_iou_w"].T + raw["U_iou_b"])
        i, o, u = sig(iou[:H]), sig(iou[H:2 * H]), np.tanh(iou[2 * H:])
        wfx = x @ raw["W_f_w"].T + raw["W_f_b"]
        f = sig(wfx[None, :] + h_children @ raw["U_f_w"].T + raw["U_f_b"])
        c = i * u + (f * c_children).sum(axis=0)
        h = o * np.tanh(c)
        return h, c

    def recurse(node):
        label, children = tree[node]
        x = emb[label]
        if not children:
            hc = np.zeros((1, H), np.float32)
            cc = np.zeros((1, H), np.float32)
        else:
            hs, cs = zip(*[recurse(ch) for ch in children])
            hc = np.stack(hs)
            cc = np.stack(cs)
        return cell(x, hc, cc)

    return recurse(root)[0]


# ----------------------------- main ------------------------------------------
if __name__ == "__main__":
    key = jax.random.PRNGKey(0)
    params, raw = init_params(key, INPUT_DIM, HIDDEN_DIM, VOCAB_SIZE)

    # Small example AST: node -> (label_index, children)
    tree1 = {
        "root": (3, ["a", "b"]),
        "a":    (5, ["a1", "a2", "a3"]),
        "b":    (7, ["b1"]),
        "a1":   (1, []),
        "a2":   (2, []),
        "a3":   (4, []),
        "b1":   (6, []),
    }

    # Wider/deeper tree: bottom level has 10 nodes (padded to 16 rows) and the
    # root has 8 children -> exercises wide levels and many-child forget gates.
    tree2 = {"root": (2, [f"c{i}" for i in range(8)])}
    tree2["c0"] = (9, ["c0_0", "c0_1", "c0_2"])
    tree2["c1"] = (11, ["c1_0"])
    for i in range(2, 8):
        tree2[f"c{i}"] = ((i + 3) % VOCAB_SIZE, [])
    for j in range(3):
        tree2[f"c0_{j}"] = (j + 1, [])
    tree2["c1_0"] = (5, [])

    for tree in (tree1, tree2):
        root_h = tree_lstm_forward(tree, "root", params)
        root_h = jax.block_until_ready(root_h)

        ref_h = _reference_forward_np(tree, "root", raw, params["embedding"])
        # Fused kernel sums children AFTER the U matmul (sum(h@U) == U(sum h)
        # mathematically); allow small fp drift vs. the unfused reference.
        np.testing.assert_allclose(np.asarray(root_h), ref_h,
                                   rtol=2e-3, atol=5e-4)
        assert root_h.shape == (HIDDEN_DIM,)
        assert np.all(np.isfinite(np.asarray(root_h)))

    print("KERNEL_OK")
</pallas_src>

<mosaic_0001>
module attributes {stable_mosaic.version = 11 : i64} {
  func.func @kernel(%arg0: memref<24x32xf32, #tpu.memory_space<vmem>>, %arg1: memref<32x128xf32, #tpu.memory_space<vmem>>, %arg2: memref<32x128xf32, #tpu.memory_space<vmem>>, %arg3: memref<1x128xf32, #tpu.memory_space<vmem>>, %arg4: memref<1x32xf32, #tpu.memory_space<vmem>>, %arg5: memref<24x128xf32, #tpu.memory_space<vmem>>, %arg6: memref<24x32xf32, #tpu.memory_space<vmem>>, %arg7: memref<8x32xf32, #tpu.memory_space<vmem>>, %arg8: memref<8x32xf32, #tpu.memory_space<vmem>>) attributes {dimension_semantics = [], scalar_prefetch = 0 : i64, scratch_operands = 4 : i64, tpu.core_type = #tpu.core_type<tc>} {
    %cst = arith.constant 0.000000e+00 : f32
    %0 = vector.broadcast %cst : f32 to vector<8x32xf32>
    %c0 = arith.constant 0 : index
    %c0_0 = arith.constant 0 : index
    %1 = vector.load %arg7[%c0, %c0_0] : memref<8x32xf32, #tpu.memory_space<vmem>>, vector<8x32xf32>
    tpu.vector_store %arg7[%c0, %c0_0], %0 {strides = array<i32>} : memref<8x32xf32, #tpu.memory_space<vmem>>, vector<8x32xf32>,
    %cst_1 = arith.constant 0.000000e+00 : f32
    %2 = vector.broadcast %cst_1 : f32 to vector<8x32xf32>
    %c0_2 = arith.constant 0 : index
    %c0_3 = arith.constant 0 : index
    %3 = vector.load %arg8[%c0_2, %c0_3] : memref<8x32xf32, #tpu.memory_space<vmem>>, vector<8x32xf32>
    tpu.vector_store %arg8[%c0_2, %c0_3], %2 {strides = array<i32>} : memref<8x32xf32, #tpu.memory_space<vmem>>, vector<8x32xf32>,
    %c0_4 = arith.constant 0 : index
    %c0_5 = arith.constant 0 : index
    %4 = vector.load %arg1[%c0_4, %c0_5] : memref<32x128xf32, #tpu.memory_space<vmem>>, vector<32x128xf32>
    %c0_6 = arith.constant 0 : index
    %c0_7 = arith.constant 0 : index
    %5 = vector.load %arg2[%c0_6, %c0_7] : memref<32x128xf32, #tpu.memory_space<vmem>>, vector<32x128xf32>
    %c0_8 = arith.constant 0 : index
    %c0_9 = arith.constant 0 : index
    %6 = vector.load %arg3[%c0_8, %c0_9] : memref<1x128xf32, #tpu.memory_space<vmem>>, vector<1x128xf32>
    %c0_10 = arith.constant 0 : index
    %c0_11 = arith.constant 0 : index
    %7 = vector.load %arg0[%c0_10, %c0_11] : memref<24x32xf32, #tpu.memory_space<vmem>>, vector<8x32xf32>
    %cst_12 = arith.constant dense<0.000000e+00> : vector<8x128xf32>
    %8 = tpu.matmul %7, %4, %cst_12 {dimension_numbers = #tpu.dot_dimension_numbers<[1], [0], [0], [1], [0, 0, 1, 1], [], []>} : vector<8x32xf32>, vector<32x128xf32>, vector<8x128xf32> -> vector<8x128xf32>
    %9 = vector.broadcast %6 : vector<1x128xf32> to vector<8x128xf32>
    %10 = arith.addf %8, %9 : vector<8x128xf32>
    %11 = vector.extract_strided_slice %10 {offsets = [0, 0], sizes = [1, 128], strides = [1, 1]} : vector<8x128xf32> to vector<1x128xf32>
    %12 = vector.extract_strided_slice %11 {offsets = [0, 0], sizes = [1, 96], strides = [1, 1]} : vector<1x128xf32> to vector<1x96xf32>
    %cst_13 = arith.constant 0.000000e+00 : f32
    %13 = vector.broadcast %cst_13 : f32 to vector<1x32xf32>
    %14 = vector.extract_strided_slice %12 {offsets = [0, 0], sizes = [1, 32], strides = [1, 1]} : vector<1x96xf32> to vector<1x32xf32>
    %cst_14 = arith.constant 0.000000e+00 : f32
    %15 = vector.broadcast %cst_14 : f32 to vector<1x32xf32>
    %16 = arith.subf %15, %14 : vector<1x32xf32>
    %17 = math.exp %16 : vector<1x32xf32>
    %cst_15 = arith.constant 1.000000e+00 : f32
    %18 = vector.broadcast %cst_15 : f32 to vector<1x32xf32>
    %19 = arith.addf %18, %17 : vector<1x32xf32>
    %cst_16 = arith.constant 1.000000e+00 : f32
    %20 = vector.broadcast %cst_16 : f32 to vector<1x32xf32>
    %21 = arith.divf %20, %19 : vector<1x32xf32>
    %22 = vector.extract_strided_slice %12 {offsets = [0, 32], sizes = [1, 32], strides = [1, 1]} : vector<1x96xf32> to vector<1x32xf32>
    %cst_17 = arith.constant 0.000000e+00 : f32
    %23 = vector.broadcast %cst_17 : f32 to vector<1x32xf32>
    %24 = arith.subf %23, %22 : vector<1x32xf32>
    %25 = math.exp %24 : vector<1x32xf32>
    %cst_18 = arith.constant 1.000000e+00 : f32
    %26 = vector.broadcast %cst_18 : f32 to vector<1x32xf32>
    %27 = arith.addf %26, %25 : vector<1x32xf32>
    %cst_19 = arith.constant 1.000000e+00 : f32
    %28 = vector.broadcast %cst_19 : f32 to vector<1x32xf32>
    %29 = arith.divf %28, %27 : vector<1x32xf32>
    %30 = vector.extract_strided_slice %12 {offsets = [0, 64], sizes = [1, 32], strides = [1, 1]} : vector<1x96xf32> to vector<1x32xf32>
    %31 = math.tanh %30 : vector<1x32xf32>
    %32 = arith.mulf %21, %31 : vector<1x32xf32>
    %33 = arith.addf %32, %13 : vector<1x32xf32>
    %34 = math.tanh %33 : vector<1x32xf32>
    %35 = arith.mulf %29, %34 : vector<1x32xf32>
    %c0_20 = arith.constant 0 : index
    %c0_21 = arith.constant 0 : index
    %36 = vector.load %arg7[%c0_20, %c0_21] : memref<8x32xf32, #tpu.memory_space<vmem>>, vector<1x32xf32>
    tpu.vector_store %arg7[%c0_20, %c0_21], %35 {strides = array<i32>} : memref<8x32xf32, #tpu.memory_space<vmem>>, vector<1x32xf32>,
    %c0_22 = arith.constant 0 : index
    %c0_23 = arith.constant 0 : index
    %37 = vector.load %arg8[%c0_22, %c0_23] : memref<8x32xf32, #tpu.memory_space<vmem>>, vector<1x32xf32>
    tpu.vector_store %arg8[%c0_22, %c0_23], %33 {strides = array<i32>} : memref<8x32xf32, #tpu.memory_space<vmem>>, vector<1x32xf32>,
    %38 = vector.extract_strided_slice %10 {offsets = [1, 0], sizes = [1, 128], strides = [1, 1]} : vector<8x128xf32> to vector<1x128xf32>
    %39 = vector.extract_strided_slice %38 {offsets = [0, 0], sizes = [1, 96], strides = [1, 1]} : vector<1x128xf32> to vector<1x96xf32>
    %cst_24 = arith.constant 0.000000e+00 : f32
    %40 = vector.broadcast %cst_24 : f32 to vector<1x32xf32>
    %41 = vector.extract_strided_slice %39 {offsets = [0, 0], sizes = [1, 32], strides = [1, 1]} : vector<1x96xf32> to vector<1x32xf32>
    %cst_25 = arith.constant 0.000000e+00 : f32
    %42 = vector.broadcast %cst_25 : f32 to vector<1x32xf32>
    %43 = arith.subf %42, %41 : vector<1x32xf32>
    %44 = math.exp %43 : vector<1x32xf32>
    %cst_26 = arith.constant 1.000000e+00 : f32
    %45 = vector.broadcast %cst_26 : f32 to vector<1x32xf32>
    %46 = arith.addf %45, %44 : vector<1x32xf32>
    %cst_27 = arith.constant 1.000000e+00 : f32
    %47 = vector.broadcast %cst_27 : f32 to vector<1x32xf32>
    %48 = arith.divf %47, %46 : vector<1x32xf32>
    %49 = vector.extract_strided_slice %39 {offsets = [0, 32], sizes = [1, 32], strides = [1, 1]} : vector<1x96xf32> to vector<1x32xf32>
    %cst_28 = arith.constant 0.000000e+00 : f32
    %50 = vector.broadcast %cst_28 : f32 to vector<1x32xf32>
    %51 = arith.subf %50, %49 : vector<1x32xf32>
    %52 = math.exp %51 : vector<1x32xf32>
    %cst_29 = arith.constant 1.000000e+00 : f32
    %53 = vector.broadcast %cst_29 : f32 to vector<1x32xf32>
    %54 = arith.addf %53, %52 : vector<1x32xf32>
    %cst_30 = arith.constant 1.000000e+00 : f32
    %55 = vector.broadcast %cst_30 : f32 to vector<1x32xf32>
    %56 = arith.divf %55, %54 : vector<1x32xf32>
    %57 = vector.extract_strided_slice %39 {offsets = [0, 64], sizes = [1, 32], strides = [1, 1]} : vector<1x96xf32> to vector<1x32xf32>
    %58 = math.tanh %57 : vector<1x32xf32>
    %59 = arith.mulf %48, %58 : vector<1x32xf32>
    %60 = arith.addf %59, %40 : vector<1x32xf32>
    %61 = math.tanh %60 : vector<1x32xf32>
    %62 = arith.mulf %56, %61 : vector<1x32xf32>
    %c1 = arith.constant 1 : index
    %c0_31 = arith.constant 0 : index
    %63 = vector.load %arg7[%c1, %c0_31] : memref<8x32xf32, #tpu.memory_space<vmem>>, vector<1x32xf32>
    tpu.vector_store %arg7[%c1, %c0_31], %62 {strides = array<i32>} : memref<8x32xf32, #tpu.memory_space<vmem>>, vector<1x32xf32>,
    %c1_32 = arith.constant 1 : index
    %c0_33 = arith.constant 0 : index
    %64 = vector.load %arg8[%c1_32, %c0_33] : memref<8x32xf32, #tpu.memory_space<vmem>>, vector<1x32xf32>
    tpu.vector_store %arg8[%c1_32, %c0_33], %60 {strides = array<i32>} : memref<8x32xf32, #tpu.memory_space<vmem>>, vector<1x32xf32>,
    %65 = vector.extract_strided_slice %10 {offsets = [2, 0], sizes = [1, 128], strides = [1, 1]} : vector<8x128xf32> to vector<1x128xf32>
    %66 = vector.extract_strided_slice %65 {offsets = [0, 0], sizes = [1, 96], strides = [1, 1]} : vector<1x128xf32> to vector<1x96xf32>
    %cst_34 = arith.constant 0.000000e+00 : f32
    %67 = vector.broadcast %cst_34 : f32 to vector<1x32xf32>
    %68 = vector.extract_strided_slice %66 {offsets = [0, 0], sizes = [1, 32], strides = [1, 1]} : vector<1x96xf32> to vector<1x32xf32>
    %cst_35 = arith.constant 0.000000e+00 : f32
    %69 = vector.broadcast %cst_35 : f32 to vector<1x32xf32>
    %70 = arith.subf %69, %68 : vector<1x32xf32>
    %71 = math.exp %70 : vector<1x32xf32>
    %cst_36 = arith.constant 1.000000e+00 : f32
    %72 = vector.broadcast %cst_36 : f32 to vector<1x32xf32>
    %73 = arith.addf %72, %71 : vector<1x32xf32>
    %cst_37 = arith.constant 1.000000e+00 : f32
    %74 = vector.broadcast %cst_37 : f32 to vector<1x32xf32>
    %75 = arith.divf %74, %73 : vector<1x32xf32>
    %76 = vector.extract_strided_slice %66 {offsets = [0, 32], sizes = [1, 32], strides = [1, 1]} : vector<1x96xf32> to vector<1x32xf32>
    %cst_38 = arith.constant 0.000000e+00 : f32
    %77 = vector.broadcast %cst_38 : f32 to vector<1x32xf32>
    %78 = arith.subf %77, %76 : vector<1x32xf32>
    %79 = math.exp %78 : vector<1x32xf32>
    %cst_39 = arith.constant 1.000000e+00 : f32
    %80 = vector.broadcast %cst_39 : f32 to vector<1x32xf32>
    %81 = arith.addf %80, %79 : vector<1x32xf32>
    %cst_40 = arith.constant 1.000000e+00 : f32
    %82 = vector.broadcast %cst_40 : f32 to vector<1x32xf32>
    %83 = arith.divf %82, %81 : vector<1x32xf32>
    %84 = vector.extract_strided_slice %66 {offsets = [0, 64], sizes = [1, 32], strides = [1, 1]} : vector<1x96xf32> to vector<1x32xf32>
    %85 = math.tanh %84 : vector<1x32xf32>
    %86 = arith.mulf %75, %85 : vector<1x32xf32>
    %87 = arith.addf %86, %67 : vector<1x32xf32>
    %88 = math.tanh %87 : vector<1x32xf32>
    %89 = arith.mulf %83, %88 : vector<1x32xf32>
    %c2 = arith.constant 2 : index
    %c0_41 = arith.constant 0 : index
    %90 = vector.load %arg7[%c2, %c0_41] : memref<8x32xf32, #tpu.memory_space<vmem>>, vector<1x32xf32>
    tpu.vector_store %arg7[%c2, %c0_41], %89 {strides = array<i32>} : memref<8x32xf32, #tpu.memory_space<vmem>>, vector<1x32xf32>,
    %c2_42 = arith.constant 2 : index
    %c0_43 = arith.constant 0 : index
    %91 = vector.load %arg8[%c2_42, %c0_43] : memref<8x32xf32, #tpu.memory_space<vmem>>, vector<1x32xf32>
    tpu.vector_store %arg8[%c2_42, %c0_43], %87 {strides = array<i32>} : memref<8x32xf32, #tpu.memory_space<vmem>>, vector<1x32xf32>,
    %92 = vector.extract_strided_slice %10 {offsets = [3, 0], sizes = [1, 128], strides = [1, 1]} : vector<8x128xf32> to vector<1x128xf32>
    %93 = vector.extract_strided_slice %92 {offsets = [0, 0], sizes = [1, 96], strides = [1, 1]} : vector<1x128xf32> to vector<1x96xf32>
    %cst_44 = arith.constant 0.000000e+00 : f32
    %94 = vector.broadcast %cst_44 : f32 to vector<1x32xf32>
    %95 = vector.extract_strided_slice %93 {offsets = [0, 0], sizes = [1, 32], strides = [1, 1]} : vector<1x96xf32> to vector<1x32xf32>
    %cst_45 = arith.constant 0.000000e+00 : f32
    %96 = vector.broadcast %cst_45 : f32 to vector<1x32xf32>
    %97 = arith.subf %96, %95 : vector<1x32xf32>
    %98 = math.exp %97 : vector<1x32xf32>
    %cst_46 = arith.constant 1.000000e+00 : f32
    %99 = vector.broadcast %cst_46 : f32 to vector<1x32xf32>
    %100 = arith.addf %99, %98 : vector<1x32xf32>
    %cst_47 = arith.constant 1.000000e+00 : f32
    %101 = vector.broadcast %cst_47 : f32 to vector<1x32xf32>
    %102 = arith.divf %101, %100 : vector<1x32xf32>
    %103 = vector.extract_strided_slice %93 {offsets = [0, 32], sizes = [1, 32], strides = [1, 1]} : vector<1x96xf32> to vector<1x32xf32>
    %cst_48 = arith.constant 0.000000e+00 : f32
    %104 = vector.broadcast %cst_48 : f32 to vector<1x32xf32>
    %105 = arith.subf %104, %103 : vector<1x32xf32>
    %106 = math.exp %105 : vector<1x32xf32>
    %cst_49 = arith.constant 1.000000e+00 : f32
    %107 = vector.broadcast %cst_49 : f32 to vector<1x32xf32>
    %108 = arith.addf %107, %106 : vector<1x32xf32>
    %cst_50 = arith.constant 1.000000e+00 : f32
    %109 = vector.broadcast %cst_50 : f32 to vector<1x32xf32>
    %110 = arith.divf %109, %108 : vector<1x32xf32>
    %111 = vector.extract_strided_slice %93 {offsets = [0, 64], sizes = [1, 32], strides = [1, 1]} : vector<1x96xf32> to vector<1x32xf32>
    %112 = math.tanh %111 : vector<1x32xf32>
    %113 = arith.mulf %102, %112 : vector<1x32xf32>
    %114 = arith.addf %113, %94 : vector<1x32xf32>
    %115 = math.tanh %114 : vector<1x32xf32>
    %116 = arith.mulf %110, %115 : vector<1x32xf32>
    %c3 = arith.constant 3 : index
    %c0_51 = arith.constant 0 : index
    %117 = vector.load %arg7[%c3, %c0_51] : memref<8x32xf32, #tpu.memory_space<vmem>>, vector<1x32xf32>
    tpu.vector_store %arg7[%c3, %c0_51], %116 {strides = array<i32>} : memref<8x32xf32, #tpu.memory_space<vmem>>, vector<1x32xf32>,
    %c3_52 = arith.constant 3 : index
    %c0_53 = arith.constant 0 : index
    %118 = vector.load %arg8[%c3_52, %c0_53] : memref<8x32xf32, #tpu.memory_space<vmem>>, vector<1x32xf32>
    tpu.vector_store %arg8[%c3_52, %c0_53], %114 {strides = array<i32>} : memref<8x32xf32, #tpu.memory_space<vmem>>, vector<1x32xf32>,
    %c0_54 = arith.constant 0 : index
    %c0_55 = arith.constant 0 : index
    %119 = vector.load %arg7[%c0_54, %c0_55] : memref<8x32xf32, #tpu.memory_space<vmem>>, vector<8x32xf32>
    %cst_56 = arith.constant dense<0.000000e+00> : vector<8x128xf32>
    %120 = tpu.matmul %119, %5, %cst_56 {dimension_numbers = #tpu.dot_dimension_numbers<[1], [0], [0], [1], [0, 0, 1, 1], [], []>} : vector<8x32xf32>, vector<32x128xf32>, vector<8x128xf32> -> vector<8x128xf32>
    %c0_57 = arith.constant 0 : index
    %c0_58 = arith.constant 0 : index
    %121 = vector.load %arg5[%c0_57, %c0_58] : memref<24x128xf32, #tpu.memory_space<vmem>>, vector<8x128xf32>
    tpu.vector_store %arg5[%c0_57, %c0_58], %120 {strides = array<i32>} : memref<24x128xf32, #tpu.memory_space<vmem>>, vector<8x128xf32>,
    %c0_59 = arith.constant 0 : index
    %c0_60 = arith.constant 0 : index
    %122 = vector.load %arg8[%c0_59, %c0_60] : memref<8x32xf32, #tpu.memory_space<vmem>>, vector<8x32xf32>
    %c0_61 = arith.constant 0 : index
    %c0_62 = arith.constant 0 : index
    %123 = vector.load %arg6[%c0_61, %c0_62] : memref<24x32xf32, #tpu.memory_space<vmem>>, vector<8x32xf32>
    tpu.vector_store %arg6[%c0_61, %c0_62], %122 {strides = array<i32>} : memref<24x32xf32, #tpu.memory_space<vmem>>, vector<8x32xf32>,
    %c8 = arith.constant 8 : index
    %c0_63 = arith.constant 0 : index
    %124 = vector.load %arg0[%c8, %c0_63] : memref<24x32xf32, #tpu.memory_space<vmem>>, vector<8x32xf32>
    %cst_64 = arith.constant dense<0.000000e+00> : vector<8x128xf32>
    %125 = tpu.matmul %124, %4, %cst_64 {dimension_numbers = #tpu.dot_dimension_numbers<[1], [0], [0], [1], [0, 0, 1, 1], [], []>} : vector<8x32xf32>, vector<32x128xf32>, vector<8x128xf32> -> vector<8x128xf32>
    %126 = vector.broadcast %6 : vector<1x128xf32> to vector<8x128xf32>
    %127 = arith.addf %125, %126 : vector<8x128xf32>
    %128 = vector.extract_strided_slice %127 {offsets = [0, 0], sizes = [1, 128], strides = [1, 1]} : vector<8x128xf32> to vector<1x128xf32>
    %c0_65 = arith.constant 0 : index
    %c0_66 = arith.constant 0 : index
    %129 = vector.load %arg5[%c0_65, %c0_66] : memref<24x128xf32, #tpu.memory_space<vmem>>, vector<1x128xf32>
    %c1_67 = arith.constant 1 : index
    %c0_68 = arith.constant 0 : index
    %130 = vector.load %arg5[%c1_67, %c0_68] : memref<24x128xf32, #tpu.memory_space<vmem>>, vector<1x128xf32>
    %c2_69 = arith.constant 2 : index
    %c0_70 = arith.constant 0 : index
    %131 = vector.load %arg5[%c2_69, %c0_70] : memref<24x128xf32, #tpu.memory_space<vmem>>, vector<1x128xf32>
    %c0_71 = arith.constant 0 : index
    %c0_72 = arith.constant 0 : index
    %132 = vector.load %arg6[%c0_71, %c0_72] : memref<24x32xf32, #tpu.memory_space<vmem>>, vector<1x32xf32>
    %c1_73 = arith.constant 1 : index
    %c0_74 = arith.constant 0 : index
    %133 = vector.load %arg6[%c1_73, %c0_74] : memref<24x32xf32, #tpu.memory_space<vmem>>, vector<1x32xf32>
    %c2_75 = arith.constant 2 : index
    %c0_76 = arith.constant 0 : index
    %134 = vector.load %arg6[%c2_75, %c0_76] : memref<24x32xf32, #tpu.memory_space<vmem>>, vector<1x32xf32>
    %135 = arith.addf %129, %130 : vector<1x128xf32>
    %136 = arith.addf %135, %131 : vector<1x128xf32>
    %137 = vector.extract_strided_slice %128 {offsets = [0, 0], sizes = [1, 96], strides = [1, 1]} : vector<1x128xf32> to vector<1x96xf32>
    %138 = vector.extract_strided_slice %136 {offsets = [0, 0], sizes = [1, 96], strides = [1, 1]} : vector<1x128xf32> to vector<1x96xf32>
    %139 = arith.addf %137, %138 : vector<1x96xf32>
    %cst_77 = arith.constant 0.000000e+00 : f32
    %140 = vector.broadcast %cst_77 : f32 to vector<1x32xf32>
    %141 = vector.extract_strided_slice %128 {offsets = [0, 96], sizes = [1, 32], strides = [1, 1]} : vector<1x128xf32> to vector<1x32xf32>
    %142 = vector.extract_strided_slice %129 {offsets = [0, 96], sizes = [1, 32], strides = [1, 1]} : vector<1x128xf32> to vector<1x32xf32>
    %143 = arith.addf %141, %142 : vector<1x32xf32>
    %cst_78 = arith.constant 0.000000e+00 : f32
    %144 = vector.broadcast %cst_78 : f32 to vector<1x32xf32>
    %145 = arith.subf %144, %143 : vector<1x32xf32>
    %146 = math.exp %145 : vector<1x32xf32>
    %cst_79 = arith.constant 1.000000e+00 : f32
    %147 = vector.broadcast %cst_79 : f32 to vector<1x32xf32>
    %148 = arith.addf %147, %146 : vector<1x32xf32>
    %cst_80 = arith.constant 1.000000e+00 : f32
    %149 = vector.broadcast %cst_80 : f32 to vector<1x32xf32>
    %150 = arith.divf %149, %148 : vector<1x32xf32>
    %151 = arith.mulf %150, %132 : vector<1x32xf32>
    %152 = arith.addf %140, %151 : vector<1x32xf32>
    %153 = vector.extract_strided_slice %128 {offsets = [0, 96], sizes = [1, 32], strides = [1, 1]} : vector<1x128xf32> to vector<1x32xf32>
    %154 = vector.extract_strided_slice %130 {offsets = [0, 96], sizes = [1, 32], strides = [1, 1]} : vector<1x128xf32> to vector<1x32xf32>
    %155 = arith.addf %153, %154 : vector<1x32xf32>
    %cst_81 = arith.constant 0.000000e+00 : f32
    %156 = vector.broadcast %cst_81 : f32 to vector<1x32xf32>
    %157 = arith.subf %156, %155 : vector<1x32xf32>
    %158 = math.exp %157 : vector<1x32xf32>
    %cst_82 = arith.constant 1.000000e+00 : f32
    %159 = vector.broadcast %cst_82 : f32 to vector<1x32xf32>
    %160 = arith.addf %159, %158 : vector<1x32xf32>
    %cst_83 = arith.constant 1.000000e+00 : f32
    %161 = vector.broadcast %cst_83 : f32 to vector<1x32xf32>
    %162 = arith.divf %161, %160 : vector<1x32xf32>
    %163 = arith.mulf %162, %133 : vector<1x32xf32>
    %164 = arith.addf %152, %163 : vector<1x32xf32>
    %165 = vector.extract_strided_slice %128 {offsets = [0, 96], sizes = [1, 32], strides = [1, 1]} : vector<1x128xf32> to vector<1x32xf32>
    %166 = vector.extract_strided_slice %131 {offsets = [0, 96], sizes = [1, 32], strides = [1, 1]} : vector<1x128xf32> to vector<1x32xf32>
    %167 = arith.addf %165, %166 : vector<1x32xf32>
    %cst_84 = arith.constant 0.000000e+00 : f32
    %168 = vector.broadcast %cst_84 : f32 to vector<1x32xf32>
    %169 = arith.subf %168, %167 : vector<1x32xf32>
    %170 = math.exp %169 : vector<1x32xf32>
    %cst_85 = arith.constant 1.000000e+00 : f32
    %171 = vector.broadcast %cst_85 : f32 to vector<1x32xf32>
    %172 = arith.addf %171, %170 : vector<1x32xf32>
    %cst_86 = arith.constant 1.000000e+00 : f32
    %173 = vector.broadcast %cst_86 : f32 to vector<1x32xf32>
    %174 = arith.divf %173, %172 : vector<1x32xf32>
    %175 = arith.mulf %174, %134 : vector<1x32xf32>
    %176 = arith.addf %164, %175 : vector<1x32xf32>
    %177 = vector.extract_strided_slice %139 {offsets = [0, 0], sizes = [1, 32], strides = [1, 1]} : vector<1x96xf32> to vector<1x32xf32>
    %cst_87 = arith.constant 0.000000e+00 : f32
    %178 = vector.broadcast %cst_87 : f32 to vector<1x32xf32>
    %179 = arith.subf %178, %177 : vector<1x32xf32>
    %180 = math.exp %179 : vector<1x32xf32>
    %cst_88 = arith.constant 1.000000e+00 : f32
    %181 = vector.broadcast %cst_88 : f32 to vector<1x32xf32>
    %182 = arith.addf %181, %180 : vector<1x32xf32>
    %cst_89 = arith.constant 1.000000e+00 : f32
    %183 = vector.broadcast %cst_89 : f32 to vector<1x32xf32>
    %184 = arith.divf %183, %182 : vector<1x32xf32>
    %185 = vector.extract_strided_slice %139 {offsets = [0, 32], sizes = [1, 32], strides = [1, 1]} : vector<1x96xf32> to vector<1x32xf32>
    %cst_90 = arith.constant 0.000000e+00 : f32
    %186 = vector.broadcast %cst_90 : f32 to vector<1x32xf32>
    %187 = arith.subf %186, %185 : vector<1x32xf32>
    %188 = math.exp %187 : vector<1x32xf32>
    %cst_91 = arith.constant 1.000000e+00 : f32
    %189 = vector.broadcast %cst_91 : f32 to vector<1x32xf32>
    %190 = arith.addf %189, %188 : vector<1x32xf32>
    %cst_92 = arith.constant 1.000000e+00 : f32
    %191 = vector.broadcast %cst_92 : f32 to vector<1x32xf32>
    %192 = arith.divf %191, %190 : vector<1x32xf32>
    %193 = vector.extract_strided_slice %139 {offsets = [0, 64], sizes = [1, 32], strides = [1, 1]} : vector<1x96xf32> to vector<1x32xf32>
    %194 = math.tanh %193 : vector<1x32xf32>
    %195 = arith.mulf %184, %194 : vector<1x32xf32>
    %196 = arith.addf %195, %176 : vector<1x32xf32>
    %197 = math.tanh %196 : vector<1x32xf32>
    %198 = arith.mulf %192, %197 : vector<1x32xf32>
    %c0_93 = arith.constant 0 : index
    %c0_94 = arith.constant 0 : index
    %199 = vector.load %arg7[%c0_93, %c0_94] : memref<8x32xf32, #tpu.memory_space<vmem>>, vector<1x32xf32>
    tpu.vector_store %arg7[%c0_93, %c0_94], %198 {strides = array<i32>} : memref<8x32xf32, #tpu.memory_space<vmem>>, vector<1x32xf32>,
    %c0_95 = arith.constant 0 : index
    %c0_96 = arith.constant 0 : index
    %200 = vector.load %arg8[%c0_95, %c0_96] : memref<8x32xf32, #tpu.memory_space<vmem>>, vector<1x32xf32>
    tpu.vector_store %arg8[%c0_95, %c0_96], %196 {strides = array<i32>} : memref<8x32xf32, #tpu.memory_space<vmem>>, vector<1x32xf32>,
    %201 = vector.extract_strided_slice %127 {offsets = [1, 0], sizes = [1, 128], strides = [1, 1]} : vector<8x128xf32> to vector<1x128xf32>
    %c3_97 = arith.constant 3 : index
    %c0_98 = arith.constant 0 : index
    %202 = vector.load %arg5[%c3_97, %c0_98] : memref<24x128xf32, #tpu.memory_space<vmem>>, vector<1x128xf32>
    %c3_99 = arith.constant 3 : index
    %c0_100 = arith.constant 0 : index
    %203 = vector.load %arg6[%c3_99, %c0_100] : memref<24x32xf32, #tpu.memory_space<vmem>>, vector<1x32xf32>
    %204 = vector.extract_strided_slice %201 {offsets = [0, 0], sizes = [1, 96], strides = [1, 1]} : vector<1x128xf32> to vector<1x96xf32>
    %205 = vector.extract_strided_slice %202 {offsets = [0, 0], sizes = [1, 96], strides = [1, 1]} : vector<1x128xf32> to vector<1x96xf32>
    %206 = arith.addf %204, %205 : vector<1x96xf32>
    %cst_101 = arith.constant 0.000000e+00 : f32
    %207 = vector.broadcast %cst_101 : f32 to vector<1x32xf32>
    %208 = vector.extract_strided_slice %201 {offsets = [0, 96], sizes = [1, 32], strides = [1, 1]} : vector<1x128xf32> to vector<1x32xf32>
    %209 = vector.extract_strided_slice %202 {offsets = [0, 96], sizes = [1, 32], strides = [1, 1]} : vector<1x128xf32> to vector<1x32xf32>
    %210 = arith.addf %208, %209 : vector<1x32xf32>
    %cst_102 = arith.constant 0.000000e+00 : f32
    %211 = vector.broadcast %cst_102 : f32 to vector<1x32xf32>
    %212 = arith.subf %211, %210 : vector<1x32xf32>
    %213 = math.exp %212 : vector<1x32xf32>
    %cst_103 = arith.constant 1.000000e+00 : f32
    %214 = vector.broadcast %cst_103 : f32 to vector<1x32xf32>
    %215 = arith.addf %214, %213 : vector<1x32xf32>
    %cst_104 = arith.constant 1.000000e+00 : f32
    %216 = vector.broadcast %cst_104 : f32 to vector<1x32xf32>
    %217 = arith.divf %216, %215 : vector<1x32xf32>
    %218 = arith.mulf %217, %203 : vector<1x32xf32>
    %219 = arith.addf %207, %218 : vector<1x32xf32>
    %220 = vector.extract_strided_slice %206 {offsets = [0, 0], sizes = [1, 32], strides = [1, 1]} : vector<1x96xf32> to vector<1x32xf32>
    %cst_105 = arith.constant 0.000000e+00 : f32
    %221 = vector.broadcast %cst_105 : f32 to vector<1x32xf32>
    %222 = arith.subf %221, %220 : vector<1x32xf32>
    %223 = math.exp %222 : vector<1x32xf32>
    %cst_106 = arith.constant 1.000000e+00 : f32
    %224 = vector.broadcast %cst_106 : f32 to vector<1x32xf32>
    %225 = arith.addf %224, %223 : vector<1x32xf32>
    %cst_107 = arith.constant 1.000000e+00 : f32
    %226 = vector.broadcast %cst_107 : f32 to vector<1x32xf32>
    %227 = arith.divf %226, %225 : vector<1x32xf32>
    %228 = vector.extract_strided_slice %206 {offsets = [0, 32], sizes = [1, 32], strides = [1, 1]} : vector<1x96xf32> to vector<1x32xf32>
    %cst_108 = arith.constant 0.000000e+00 : f32
    %229 = vector.broadcast %cst_108 : f32 to vector<1x32xf32>
    %230 = arith.subf %229, %228 : vector<1x32xf32>
    %231 = math.exp %230 : vector<1x32xf32>
    %cst_109 = arith.constant 1.000000e+00 : f32
    %232 = vector.broadcast %cst_109 : f32 to vector<1x32xf32>
    %233 = arith.addf %232, %231 : vector<1x32xf32>
    %cst_110 = arith.constant 1.000000e+00 : f32
    %234 = vector.broadcast %cst_110 : f32 to vector<1x32xf32>
    %235 = arith.divf %234, %233 : vector<1x32xf32>
    %236 = vector.extract_strided_slice %206 {offsets = [0, 64], sizes = [1, 32], strides = [1, 1]} : vector<1x96xf32> to vector<1x32xf32>
    %237 = math.tanh %236 : vector<1x32xf32>
    %238 = arith.mulf %227, %237 : vector<1x32xf32>
    %239 = arith.addf %238, %219 : vector<1x32xf32>
    %240 = math.tanh %239 : vector<1x32xf32>
    %241 = arith.mulf %235, %240 : vector<1x32xf32>
    %c1_111 = arith.constant 1 : index
    %c0_112 = arith.constant 0 : index
    %242 = vector.load %arg7[%c1_111, %c0_112] : memref<8x32xf32, #tpu.memory_space<vmem>>, vector<1x32xf32>
    tpu.vector_store %arg7[%c1_111, %c0_112], %241 {strides = array<i32>} : memref<8x32xf32, #tpu.memory_space<vmem>>, vector<1x32xf32>,
    %c1_113 = arith.constant 1 : index
    %c0_114 = arith.constant 0 : index
    %243 = vector.load %arg8[%c1_113, %c0_114] : memref<8x32xf32, #tpu.memory_space<vmem>>, vector<1x32xf32>
    tpu.vector_store %arg8[%c1_113, %c0_114], %239 {strides = array<i32>} : memref<8x32xf32, #tpu.memory_space<vmem>>, vector<1x32xf32>,
    %c0_115 = arith.constant 0 : index
    %c0_116 = arith.constant 0 : index
    %244 = vector.load %arg7[%c0_115, %c0_116] : memref<8x32xf32, #tpu.memory_space<vmem>>, vector<8x32xf32>
    %cst_117 = arith.constant dense<0.000000e+00> : vector<8x128xf32>
    %245 = tpu.matmul %244, %5, %cst_117 {dimension_numbers = #tpu.dot_dimension_numbers<[1], [0], [0], [1], [0, 0, 1, 1], [], []>} : vector<8x32xf32>, vector<32x128xf32>, vector<8x128xf32> -> vector<8x128xf32>
    %c8_118 = arith.constant 8 : index
    %c0_119 = arith.constant 0 : index
    %246 = vector.load %arg5[%c8_118, %c0_119] : memref<24x128xf32, #tpu.memory_space<vmem>>, vector<8x128xf32>
    tpu.vector_store %arg5[%c8_118, %c0_119], %245 {strides = array<i32>} : memref<24x128xf32, #tpu.memory_space<vmem>>, vector<8x128xf32>,
    %c0_120 = arith.constant 0 : index
    %c0_121 = arith.constant 0 : index
    %247 = vector.load %arg8[%c0_120, %c0_121] : memref<8x32xf32, #tpu.memory_space<vmem>>, vector<8x32xf32>
    %c8_122 = arith.constant 8 : index
    %c0_123 = arith.constant 0 : index
    %248 = vector.load %arg6[%c8_122, %c0_123] : memref<24x32xf32, #tpu.memory_space<vmem>>, vector<8x32xf32>
    tpu.vector_store %arg6[%c8_122, %c0_123], %247 {strides = array<i32>} : memref<24x32xf32, #tpu.memory_space<vmem>>, vector<8x32xf32>,
    %c16 = arith.constant 16 : index
    %c0_124 = arith.constant 0 : index
    %249 = vector.load %arg0[%c16, %c0_124] : memref<24x32xf32, #tpu.memory_space<vmem>>, vector<8x32xf32>
    %cst_125 = arith.constant dense<0.000000e+00> : vector<8x128xf32>
    %250 = tpu.matmul %249, %4, %cst_125 {dimension_numbers = #tpu.dot_dimension_numbers<[1], [0], [0], [1], [0, 0, 1, 1], [], []>} : vector<8x32xf32>, vector<32x128xf32>, vector<8x128xf32> -> vector<8x128xf32>
    %251 = vector.broadcast %6 : vector<1x128xf32> to vector<8x128xf32>
    %252 = arith.addf %250, %251 : vector<8x128xf32>
    %253 = vector.extract_strided_slice %252 {offsets = [0, 0], sizes = [1, 128], strides = [1, 1]} : vector<8x128xf32> to vector<1x128xf32>
    %c8_126 = arith.constant 8 : index
    %c0_127 = arith.constant 0 : index
    %254 = vector.load %arg5[%c8_126, %c0_127] : memref<24x128xf32, #tpu.memory_space<vmem>>, vector<1x128xf32>
    %c9 = arith.constant 9 : index
    %c0_128 = arith.constant 0 : index
    %255 = vector.load %arg5[%c9, %c0_128] : memref<24x128xf32, #tpu.memory_space<vmem>>, vector<1x128xf32>
    %c8_129 = arith.constant 8 : index
    %c0_130 = arith.constant 0 : index
    %256 = vector.load %arg6[%c8_129, %c0_130] : memref<24x32xf32, #tpu.memory_space<vmem>>, vector<1x32xf32>
    %c9_131 = arith.constant 9 : index
    %c0_132 = arith.constant 0 : index
    %257 = vector.load %arg6[%c9_131, %c0_132] : memref<24x32xf32, #tpu.memory_space<vmem>>, vector<1x32xf32>
    %258 = arith.addf %254, %255 : vector<1x128xf32>
    %259 = vector.extract_strided_slice %253 {offsets = [0, 0], sizes = [1, 96], strides = [1, 1]} : vector<1x128xf32> to vector<1x96xf32>
    %260 = vector.extract_strided_slice %258 {offsets = [0, 0], sizes = [1, 96], strides = [1, 1]} : vector<1x128xf32> to vector<1x96xf32>
    %261 = arith.addf %259, %260 : vector<1x96xf32>
    %cst_133 = arith.constant 0.000000e+00 : f32
    %262 = vector.broadcast %cst_133 : f32 to vector<1x32xf32>
    %263 = vector.extract_strided_slice %253 {offsets = [0, 96], sizes = [1, 32], strides = [1, 1]} : vector<1x128xf32> to vector<1x32xf32>
    %264 = vector.extract_strided_slice %254 {offsets = [0, 96], sizes = [1, 32], strides = [1, 1]} : vector<1x128xf32> to vector<1x32xf32>
    %265 = arith.addf %263, %264 : vector<1x32xf32>
    %cst_134 = arith.constant 0.000000e+00 : f32
    %266 = vector.broadcast %cst_134 : f32 to vector<1x32xf32>
    %267 = arith.subf %266, %265 : vector<1x32xf32>
    %268 = math.exp %267 : vector<1x32xf32>
    %cst_135 = arith.constant 1.000000e+00 : f32
    %269 = vector.broadcast %cst_135 : f32 to vector<1x32xf32>
    %270 = arith.addf %269, %268 : vector<1x32xf32>
    %cst_136 = arith.constant 1.000000e+00 : f32
    %271 = vector.broadcast %cst_136 : f32 to vector<1x32xf32>
    %272 = arith.divf %271, %270 : vector<1x32xf32>
    %273 = arith.mulf %272, %256 : vector<1x32xf32>
    %274 = arith.addf %262, %273 : vector<1x32xf32>
    %275 = vector.extract_strided_slice %253 {offsets = [0, 96], sizes = [1, 32], strides = [1, 1]} : vector<1x128xf32> to vector<1x32xf32>
    %276 = vector.extract_strided_slice %255 {offsets = [0, 96], sizes = [1, 32], strides = [1, 1]} : vector<1x128xf32> to vector<1x32xf32>
    %277 = arith.addf %275, %276 : vector<1x32xf32>
    %cst_137 = arith.constant 0.000000e+00 : f32
    %278 = vector.broadcast %cst_137 : f32 to vector<1x32xf32>
    %279 = arith.subf %278, %277 : vector<1x32xf32>
    %280 = math.exp %279 : vector<1x32xf32>
    %cst_138 = arith.constant 1.000000e+00 : f32
    %281 = vector.broadcast %cst_138 : f32 to vector<1x32xf32>
    %282 = arith.addf %281, %280 : vector<1x32xf32>
    %cst_139 = arith.constant 1.000000e+00 : f32
    %283 = vector.broadcast %cst_139 : f32 to vector<1x32xf32>
    %284 = arith.divf %283, %282 : vector<1x32xf32>
    %285 = arith.mulf %284, %257 : vector<1x32xf32>
    %286 = arith.addf %274, %285 : vector<1x32xf32>
    %287 = vector.extract_strided_slice %261 {offsets = [0, 0], sizes = [1, 32], strides = [1, 1]} : vector<1x96xf32> to vector<1x32xf32>
    %cst_140 = arith.constant 0.000000e+00 : f32
    %288 = vector.broadcast %cst_140 : f32 to vector<1x32xf32>
    %289 = arith.subf %288, %287 : vector<1x32xf32>
    %290 = math.exp %289 : vector<1x32xf32>
    %cst_141 = arith.constant 1.000000e+00 : f32
    %291 = vector.broadcast %cst_141 : f32 to vector<1x32xf32>
    %292 = arith.addf %291, %290 : vector<1x32xf32>
    %cst_142 = arith.constant 1.000000e+00 : f32
    %293 = vector.broadcast %cst_142 : f32 to vector<1x32xf32>
    %294 = arith.divf %293, %292 : vector<1x32xf32>
    %295 = vector.extract_strided_slice %261 {offsets = [0, 32], sizes = [1, 32], strides = [1, 1]} : vector<1x96xf32> to vector<1x32xf32>
    %cst_143 = arith.constant 0.000000e+00 : f32
    %296 = vector.broadcast %cst_143 : f32 to vector<1x32xf32>
    %297 = arith.subf %296, %295 : vector<1x32xf32>
    %298 = math.exp %297 : vector<1x32xf32>
    %cst_144 = arith.constant 1.000000e+00 : f32
    %299 = vector.broadcast %cst_144 : f32 to vector<1x32xf32>
    %300 = arith.addf %299, %298 : vector<1x32xf32>
    %cst_145 = arith.constant 1.000000e+00 : f32
    %301 = vector.broadcast %cst_145 : f32 to vector<1x32xf32>
    %302 = arith.divf %301, %300 : vector<1x32xf32>
    %303 = vector.extract_strided_slice %261 {offsets = [0, 64], sizes = [1, 32], strides = [1, 1]} : vector<1x96xf32> to vector<1x32xf32>
    %304 = math.tanh %303 : vector<1x32xf32>
    %305 = arith.mulf %294, %304 : vector<1x32xf32>
    %306 = arith.addf %305, %286 : vector<1x32xf32>
    %307 = math.tanh %306 : vector<1x32xf32>
    %308 = arith.mulf %302, %307 : vector<1x32xf32>
    %c0_146 = arith.constant 0 : index
    %c0_147 = arith.constant 0 : index
    %309 = vector.load %arg7[%c0_146, %c0_147] : memref<8x32xf32, #tpu.memory_space<vmem>>, vector<1x32xf32>
    tpu.vector_store %arg7[%c0_146, %c0_147], %308 {strides = array<i32>} : memref<8x32xf32, #tpu.memory_space<vmem>>, vector<1x32xf32>,
    %c0_148 = arith.constant 0 : index
    %c0_149 = arith.constant 0 : index
    %310 = vector.load %arg8[%c0_148, %c0_149] : memref<8x32xf32, #tpu.memory_space<vmem>>, vector<1x32xf32>
    tpu.vector_store %arg8[%c0_148, %c0_149], %306 {strides = array<i32>} : memref<8x32xf32, #tpu.memory_space<vmem>>, vector<1x32xf32>,
    %c0_150 = arith.constant 0 : index
    %c0_151 = arith.constant 0 : index
    %311 = vector.load %arg4[%c0_150, %c0_151] : memref<1x32xf32, #tpu.memory_space<vmem>>, vector<1x32xf32>
    tpu.vector_store %arg4[%c0_150, %c0_151], %308 {strides = array<i32>} : memref<1x32xf32, #tpu.memory_space<vmem>>, vector<1x32xf32>,
    %c0_152 = arith.constant 0 : index
    %c0_153 = arith.constant 0 : index
    %312 = vector.load %arg7[%c0_152, %c0_153] : memref<8x32xf32, #tpu.memory_space<vmem>>, vector<8x32xf32>
    %cst_154 = arith.constant dense<0.000000e+00> : vector<8x128xf32>
    %313 = tpu.matmul %312, %5, %cst_154 {dimension_numbers = #tpu.dot_dimension_numbers<[1], [0], [0], [1], [0, 0, 1, 1], [], []>} : vector<8x32xf32>, vector<32x128xf32>, vector<8x128xf32> -> vector<8x128xf32>
    %c16_155 = arith.constant 16 : index
    %c0_156 = arith.constant 0 : index
    %314 = vector.load %arg5[%c16_155, %c0_156] : memref<24x128xf32, #tpu.memory_space<vmem>>, vector<8x128xf32>
    tpu.vector_store %arg5[%c16_155, %c0_156], %313 {strides = array<i32>} : memref<24x128xf32, #tpu.memory_space<vmem>>, vector<8x128xf32>,
    %c0_157 = arith.constant 0 : index
    %c0_158 = arith.constant 0 : index
    %315 = vector.load %arg8[%c0_157, %c0_158] : memref<8x32xf32, #tpu.memory_space<vmem>>, vector<8x32xf32>
    %c16_159 = arith.constant 16 : index
    %c0_160 = arith.constant 0 : index
    %316 = vector.load %arg6[%c16_159, %c0_160] : memref<24x32xf32, #tpu.memory_space<vmem>>, vector<8x32xf32>
    tpu.vector_store %arg6[%c16_159, %c0_160], %315 {strides = array<i32>} : memref<24x32xf32, #tpu.memory_space<vmem>>, vector<8x32xf32>,
    return
  }
}

</mosaic_0001>

<bundles_post_ra>
// kernel: run.1
= control target key start
LH: loop header
LB: loop body
LE: loop exit
PB: predicated region body
PF: predicated region fallthrough
CT: control target
= control target key end

     0   :  { %vm18_vm0 = vcmask 261120   ;;  %v902_v1 = vmov 0.0   ;;  %vm903_vm1 = vmmov 0   ;;  %s1101_s0 = inlined_call_operand.vmem [shape: f32[24,32], index: 0, kind: input, shape index: {}]   ;;  %s1102_s1 = inlined_call_operand.vmem [shape: f32[32,128], index: 1, kind: input, shape index: {}]   ;;  %s1103_s2 = inlined_call_operand.vmem [shape: f32[32,128], index: 2, kind: input, shape index: {}]   ;;  %s1104_s3 = inlined_call_operand.vmem [shape: f32[1,128], index: 3, kind: input, shape index: {}]   ;;  %s1105_s4 = inlined_call_operand.hbm [shape: f32[1,32], index: 4, kind: output, shape index: {}]  }
   0x1   :  { %v936_v0 = vld [vmem:[%s1102_s1 + $0x18] sm:$0xff]  ;;  %756 = vmatprep.subr.mxu0 %v902_v1  ;;  %v942_v2 = vld [vmem:[%s1102_s1 + $0x10] sm:$0xff]  ;;  %764 = vmatprep.mubr.msk.f32.mxu0 %vm903_vm1, %v902_v1  ;;  %19 = vst.msk [vmem:[#allocation4] sm:$0xff] %vm18_vm0, %v902_v1  ;;  %20 = vst.msk [vmem:[#allocation5] sm:$0xff] %vm18_vm0, %v902_v1 }
   0x2   :  { %757 = vmatpush3.msra.mxu0 %v936_v0  ;;  %767 = vmatprep.subr.mxu1 %v902_v1 }
   0x3   :  { %9 = vsyncpa [#allocation7], 0  ;;  %758 = vmatprep.subr.mxu0 %v902_v1  ;;  %v956_v3 = vld [vmem:[%s1102_s1 + $0x8] sm:$0xff]  ;;  %775 = vmatprep.mubr.msk.f32.mxu1 %vm903_vm1, %v902_v1  ;;  %v965_v4 = vld [vmem:[%s1102_s1] sm:$0xff]  ;;  %s904_s26 = smov 64   ;;  %vm133_vm2 = vcmask 253952  }
   0x4   :  { %759 = vmatpush3.msra.mxu0 %v942_v2  ;;  %v30_v5 = vld [vmem:[%s1101_s0] sm:$0xff]  ;;  %vm136_vm3 = vcmask 254977   ;;  %vm139_vm4 = vcmask 256002   ;;  %vm142_vm5 = vcmask 257027   ;;  %s906_s27 = smov 96   ;;  %v1003_v23 = vld [vmem:[%s1103_s2 + $0x18] sm:$0xff] }
   0x5   :  { %760 = vmatprep.subr.mxu0 %v902_v1  ;;  %v988_v6 = vld [vmem:[%s1104_s3] ss:$0 sm:$0xff]  ;;  %s905_s3 = smov 32   ;;  %v1008_v24 = vld [vmem:[%s1103_s2 + $0x10] sm:$0xff]  ;;  %768 = vmatpush3.msra.mxu1 %v1003_v23  ;;  %v1016_v25 = vld [vmem:[%s1103_s2 + $0x8] sm:$0xff] }
   0x6   :  { %761 = vmatpush3.msra.mxu0 %v956_v3  ;;  %769 = vmatprep.subr.mxu1 %v902_v1  ;;  %v1022_v26 = vld [vmem:[%s1103_s2] sm:$0xff]  ;;  %v222_v27 = vld [vmem:[%s1101_s0 + $0x8] sm:$0xff] }
   0x7   :  { %762 = vmatprep.subr.mxu0 %v902_v1  ;;  %770 = vmatpush3.msra.mxu1 %v1008_v24 }
   0x8   :  { %763 = vmatpush3.msra.mxu0 %v965_v4  ;;  %771 = vmatprep.subr.mxu1 %v902_v1 }
   0x9   :  { %765 = vmatmul.mubr.msk.f32.vlgmr.msra.gmra.mxu0 %vm18_vm0, %v30_v5  ;;  %778 = vmatprep.subr.mxu0 %v902_v1 }
   0xa   :  { %779 = vmatpush3.msra.mxu0 %v936_v0  ;;  %786 = vmatprep.mubr.msk.f32.mxu0 %vm903_vm1, %v902_v1 }
   0xb   :  { %780 = vmatprep.subr.mxu0 %v902_v1  ;;  %772 = vmatpush3.msra.mxu1 %v1016_v25 }
   0xc   :  { %781 = vmatpush3.msra.mxu0 %v942_v2  ;;  %773 = vmatprep.subr.mxu1 %v902_v1 }
   0xd   :  { %782 = vmatprep.subr.mxu0 %v902_v1  ;;  %774 = vmatpush3.msra.mxu1 %v1022_v26 }
   0xe   :  { %783 = vmatpush3.msra.mxu0 %v956_v3  ;;  %789 = vmatprep.subr.mxu1 %v902_v1 }
   0xf   :  { %784 = vmatprep.subr.mxu0 %v902_v1 }
  0x10   :  { %785 = vmatpush3.msra.mxu0 %v965_v4 }
  0x11   :  { %800 = vmatprep.subr.mxu0 %v902_v1  ;;  %787 = vmatmul.mubr.msk.f32.vlgmr.msra.gmra.mxu0 %vm18_vm0, %v222_v27 }
  0x12   :  { %801 = vmatpush3.msra.mxu0 %v936_v0  ;;  %808 = vmatprep.mubr.msk.f32.mxu0 %vm903_vm1, %v902_v1 }
  0x13   :  { %802 = vmatprep.subr.mxu0 %v902_v1 }
  0x14   :  { %803 = vmatpush3.msra.mxu0 %v942_v2 }
  0x15   :  { %804 = vmatprep.subr.mxu0 %v902_v1 }
  0x16   :  { %805 = vmatpush3.msra.mxu0 %v956_v3 }
  0x17   :  { %806 = vmatprep.subr.mxu0 %v902_v1 }
  0x18   :  { %807 = vmatpush3.msra.mxu0 %v965_v4 }
  0xc9   :  { %v106_v7 = vpop.f32.mrf.mxu0 }
  0xca   :  { %v107_v8 = vadd.f32 %v988_v6, %v106_v7 }
  0xcb   :  { %v766_v9 = vpop.f32.mrf.mxu0 }
  0xcc   :  { %828 = vtanh.f32 %v107_v8  ;;  %v110_v11 = vsub.f32 0.0, %v107_v8 }
  0xce   :  { %v111_v12 = vmul.f32 1.442695, %v110_v11 }
  0xd0   :  { %830 = vpow2.f32 %v111_v12 }
  0xd1   :  { %v292_v34 = vpop.f32.mrf.mxu0 }
  0xd2   :  { %v293_v38 = vadd.f32 %v988_v6, %v292_v34 }
  0xd3   :  { %v788_v35 = vpop.f32.mrf.mxu0 }
  0xd9   :  { %v829_v10 = vpop.eup %828 }
  0xda   :  { %118 = vrot.lane.b32.xlu0 %v829_v10, %s904_s26 }
  0xdd   :  { %v831_v13 = vpop.eup %830 }
  0xde   :  { %v113_v14 = vadd.f32 1.0, %v831_v13 }
  0xe0   :  { %832 = vrcp.f32 %v113_v14 }
  0xed   :  { %v833_v15 = vpop.eup %832 }
 0x14c   :  { %v119_v16 = vpop.permute.xlu0 %118 }
 0x14d   :  { %v121_v17 = vmul.f32 %v833_v15, %v119_v16 }
 0x14f   :  { %834 = vtanh.f32 %v121_v17  ;;  %135 = vst.msk [vmem:[#allocation5] sm:$0x1] %vm133_vm2, %v121_v17 }
 0x150   :  { %138 = vst.msk [vmem:[#allocation5] sm:$0x2] %vm136_vm3, %v121_v17 }
 0x151   :  { %141 = vst.msk [vmem:[#allocation5] sm:$0x4] %vm139_vm4, %v121_v17 }
 0x152   :  { %144 = vst.msk [vmem:[#allocation5] sm:$0x8] %vm142_vm5, %v121_v17 }
 0x159   :  { %v220_v18 = vld [vmem:[#allocation5] sm:$0xff] }
 0x15a   :  { %221 = vst.msk [vmem:[#allocation3] sm:$0xff] %vm18_vm0, %v220_v18 }
 0x15c   :  { %v835_v19 = vpop.eup %834 }
 0x15d   :  { %125 = vrot.lane.b32.xlu0 %v835_v19, %s905_s3 }
 0x161   :  { %v300_v20 = vld [vmem:[#allocation3 + $0x1] sm:$0x1]  ;;  %v374_v21 = vld [vmem:[#allocation3 + $0x3] sm:$0x1]  ;;  %v299_v30 = vld [vmem:[#allocation3] sm:$0x1] }
 0x162   :  { %326 = vrot.lane.b32.xlu0 %v300_v20, %s906_s27  ;;  %v386_v22 = vrot.slane %v374_v21, 7  ;;  %v301_v31 = vld [vmem:[#allocation3 + $0x2] sm:$0x1] }
 0x166   :  { %387 = vrot.lane.b32.xlu0 %v386_v22, %s906_s27 }
 0x1cf   :  { %v126_v28 = vpop.permute.xlu0 %125 }
 0x1d0   :  { %v128_v29 = vmul.f32 %v833_v15, %v126_v28 }
 0x1d2   :  { %130 = vrot.lane.b32.xlu1 %v128_v29, %s906_s27 }
 0x1d4   :  { %v327_v8 = vpop.permute.xlu0 %326 }
 0x1d6   :  { %313 = vrot.lane.b32.xlu1 %v299_v30, %s906_s27 }
 0x1d8   :  { %v388_v18 = vpop.permute.xlu0 %387 }
 0x1da   :  { %339 = vrot.lane.b32.xlu1 %v301_v31, %s906_s27 }
 0x244   :  { %v131_v32 = vpop.permute.xlu1 %130 }
 0x245   :  { %134 = vst.msk [vmem:[#allocation4] sm:$0x1] %vm133_vm2, %v131_v32 }
 0x246   :  { %137 = vst.msk [vmem:[#allocation4] sm:$0x2] %vm136_vm3, %v131_v32 }
 0x247   :  { %140 = vst.msk [vmem:[#allocation4] sm:$0x4] %vm139_vm4, %v131_v32 }
 0x248   :  { %143 = vst.msk [vmem:[#allocation4] sm:$0x8] %vm142_vm5, %v131_v32  ;;  %v314_v7 = vpop.permute.xlu1 %313 }
 0x24c   :  { %v340_v14 = vpop.permute.xlu1 %339 }
 0x24f   :  { %v145_v33 = vld [vmem:[#allocation4] sm:$0xff] }
 0x250   :  { %776 = vmatmul.mubr.msk.f32.vlgmr.msra.gmra.mxu1 %vm18_vm0, %v145_v33 }
 0x251   :  { %790 = vmatpush3.msra.mxu1 %v1003_v23  ;;  %797 = vmatprep.mubr.msk.f32.mxu1 %vm903_vm1, %v902_v1 }
 0x252   :  { %791 = vmatprep.subr.mxu1 %v902_v1 }
 0x253   :  { %792 = vmatpush3.msra.mxu1 %v1008_v24 }
 0x254   :  { %793 = vmatprep.subr.mxu1 %v902_v1 }
 0x255   :  { %794 = vmatpush3.msra.mxu1 %v1016_v25 }
 0x256   :  { %795 = vmatprep.subr.mxu1 %v902_v1 }
 0x257   :  { %796 = vmatpush3.msra.mxu1 %v1022_v26 }
 0x258   :  { %811 = vmatprep.subr.mxu1 %v902_v1 }
 0x310   :  { %v215_v36 = vpop.f32.mrf.mxu1 }
 0x311   :  { %219 = vst [vmem:[#allocation2] sm:$0xff] %v215_v36 }
 0x312   :  { %v777_v37 = vpop.f32.mrf.mxu1 }
 0x318   :  { %v296_v39 = vld [vmem:[#allocation2] sm:$0x1]  ;;  %v297_v40 = vld [vmem:[#allocation2 + $0x1] sm:$0x1]  ;;  %v298_v41 = vld [vmem:[#allocation2 + $0x2] sm:$0x1] }
 0x319   :  { %v302_v42 = vadd.f32 %v297_v40, %v296_v39  ;;  %v305_v43 = vadd.f32 %v296_v39, %v293_v38  ;;  %v318_v44 = vadd.f32 %v297_v40, %v293_v38  ;;  %v331_v45 = vadd.f32 %v298_v41, %v293_v38  ;;  %v373_v46 = vld [vmem:[#allocation2 + $0x3] sm:$0x1] }
 0x31a   :  { %v376_v47 = vrot.slane %v373_v46, 7 }
 0x31b   :  { %v303_v48 = vadd.f32 %v302_v42, %v298_v41  ;;  %v306_v49 = vsub.f32 0.0, %v305_v43  ;;  %v319_v50 = vsub.f32 0.0, %v318_v44  ;;  %v332_v51 = vsub.f32 0.0, %v331_v45  ;;  %v492_v41 = vld [vmem:[%s1101_s0 + $0x10] sm:$0xff]  ;;  %s907_s0 = smov [#allocation6]  }
 0x31c   :  { %v378_v52 = vadd.f32 %v376_v47, %v293_v38  ;;  %809 = vmatmul.mubr.msk.f32.vlgmr.msra.gmra.mxu0 %vm18_vm0, %v492_v41  ;;  %s711_s13 = sshll.u32 %s907_s0, 4  ;;  %s712_s13 = int_to_ptr.vmem [resolvable:$true] %s711_s13 }
 0x31d   :  { %v307_v53 = vmul.f32 1.442695, %v306_v49  ;;  %v320_v54 = vmul.f32 1.442695, %v319_v50  ;;  %v333_v55 = vmul.f32 1.442695, %v332_v51  ;;  %v304_v56 = vadd.f32 %v303_v48, %v293_v38  ;;  %p885_p1 = scmp.lt.s32.totalorder %s712_s13, %s712_s13 }
 0x31e   :  { %v379_v57 = vsub.f32 0.0, %v378_v52  ;;  %836 = vtanh.f32 %v378_v52  ;;  %s880_s14 = scalar_lea.vmem %s712_s13, 16  ;;  %s884_s15 = scalar_lea.vmem %s712_s13, 32 }
 0x31f   :  { %838 = vpow2.f32 %v307_v53  ;;  %v344_v21 = vsub.f32 0.0, %v304_v56  ;;  %p881_p0 = scmp.ne.s32.totalorder %s712_s13, %s880_s14  ;;  %p886_p2 = scmp.lt.s32.totalorder %s884_s15, %s880_s14 }
 0x320   :  { %840 = vpow2.f32 %v320_v54  ;;  %v380_v58 = vmul.f32 1.442695, %v379_v57 }
 0x321   :  { %842 = vpow2.f32 %v333_v55  ;;  %v345_v22 = vmul.f32 1.442695, %v344_v21  ;;  %p887_p3 = por %p886_p2, %p885_p1 }
 0x322   :  { %844 = vtanh.f32 %v304_v56 }
 0x323   :  { %846 = vpow2.f32 %v380_v58  ;;  %p888_p4 = pnand %p887_p3, %p881_p0 }
 0x32b   :  { %v837_v59 = vpop.eup %836 }
 0x32c   :  { %v839_v60 = vpop.eup %838  ;;  %394 = vrot.lane.b32.xlu0 %v837_v59, %s904_s26 }
 0x32d   :  { %v841_v61 = vpop.eup %840  ;;  %v309_v62 = vadd.f32 1.0, %v839_v60 }
 0x32e   :  { %v843_v63 = vpop.eup %842  ;;  %v322_v0 = vadd.f32 1.0, %v841_v61 }
 0x32f   :  { %v845_v2 = vpop.eup %844  ;;  %848 = vrcp.f32 %v309_v62  ;;  %v335_v3 = vadd.f32 1.0, %v843_v63 }
 0x330   :  { %850 = vrcp.f32 %v322_v0  ;;  %352 = vrot.lane.b32.xlu1 %v845_v2, %s904_s26  ;;  %v847_v4 = vpop.eup %846 }
 0x331   :  { %852 = vrcp.f32 %v335_v3  ;;  %v382_v5 = vadd.f32 1.0, %v847_v4 }
 0x333   :  { %854 = vrcp.f32 %v382_v5 }
 0x334   :  { %856 = vpow2.f32 %v345_v22 }
 0x33c   :  { %v849_v9 = vpop.eup %848 }
 0x33d   :  { %v851_v10 = vpop.eup %850  ;;  %v316_v11 = vmul.f32 %v849_v9, %v314_v7 }
 0x33e   :  { %v853_v12 = vpop.eup %852  ;;  %v329_v13 = vmul.f32 %v851_v10, %v327_v8 }
 0x33f   :  { %v342_v16 = vmul.f32 %v853_v12, %v340_v14 }
 0x340   :  { %v330_v15 = vadd.f32 %v329_v13, %v316_v11  ;;  %v855_v17 = vpop.eup %854 }
 0x341   :  { %v390_v19 = vmul.f32 %v855_v17, %v388_v18  ;;  %v857_v27 = vpop.eup %856 }
 0x342   :  { %v343_v20 = vadd.f32 %v342_v16, %v330_v15  ;;  %v347_v28 = vadd.f32 1.0, %v857_v27 }
 0x343   :  { %399 = vrot.lane.b32.xlu0 %v390_v19, %s905_s3 }
 0x344   :  { %357 = vrot.lane.b32.xlu1 %v343_v20, %s905_s3  ;;  %858 = vrcp.f32 %v347_v28 }
 0x351   :  { %v859_v31 = vpop.eup %858 }
 0x39e   :  { %v395_v29 = vpop.permute.xlu0 %394 }
 0x39f   :  { %v397_v32 = vmul.f32 %v855_v17, %v395_v29 }
 0x3a2   :  { %v353_v30 = vpop.permute.xlu1 %352 }
 0x3a3   :  { %v355_v33 = vmul.f32 %v859_v31, %v353_v30 }
 0x3b5   :  { %v400_v34 = vpop.permute.xlu0 %399 }
 0x3b6   :  { %v358_v35 = vpop.permute.xlu1 %357  ;;  %v402_v36 = vadd.f32 %v400_v34, %v397_v32 }
 0x3b7   :  { %v360_v37 = vadd.f32 %v358_v35, %v355_v33 }
 0x3b8   :  { %860 = vtanh.f32 %v402_v36  ;;  %414 = vst.msk [vmem:[#allocation5] sm:$0x2] %vm136_vm3, %v402_v36 }
 0x3b9   :  { %372 = vst.msk [vmem:[#allocation5] sm:$0x1] %vm133_vm2, %v360_v37  ;;  %862 = vtanh.f32 %v360_v37 }
 0x3c0   :  { %v490_v38 = vld [vmem:[#allocation5] sm:$0xff] }
 0x3c1   :  { %491 = vst.msk [vmem:[#allocation3 + $0x8] sm:$0xff] %vm18_vm0, %v490_v38 }
 0x3c5   :  { %v861_v39 = vpop.eup %860 }
 0x3c6   :  { %v863_v40 = vpop.eup %862  ;;  %405 = vrot.lane.b32.xlu0 %v861_v39, %s905_s3 }
 0x3c7   :  { %363 = vrot.lane.b32.xlu1 %v863_v40, %s905_s3 }
 0x3c8   :  { %v569_v46 = vld [vmem:[#allocation3 + $0x9] sm:$0x1]  ;;  %v568_v47 = vld [vmem:[#allocation3 + $0x8] sm:$0x1] }
 0x3dc   :  { %v562_v51 = vpop.f32.mrf.mxu0 }
 0x3dd   :  { %v563_v54 = vadd.f32 %v988_v6, %v562_v51 }
 0x3de   :  { %v810_v52 = vpop.f32.mrf.mxu0 }
 0x438   :  { %v406_v42 = vpop.permute.xlu0 %405 }
 0x439   :  { %v408_v43 = vmul.f32 %v855_v17, %v406_v42  ;;  %v364_v44 = vpop.permute.xlu1 %363 }
 0x43a   :  { %v366_v45 = vmul.f32 %v859_v31, %v364_v44 }
 0x43b   :  { %410 = vrot.lane.b32.xlu0 %v408_v43, %s906_s27 }
 0x43c   :  { %368 = vrot.lane.b32.xlu1 %v366_v45, %s906_s27 }
 0x43f   :  { %593 = vrot.lane.b32.xlu0 %v569_v46, %s906_s27 }
 0x440   :  { %580 = vrot.lane.b32.xlu1 %v568_v47, %s906_s27 }
 0x4ad   :  { %v411_v48 = vpop.permute.xlu0 %410 }
 0x4ae   :  { %413 = vst.msk [vmem:[#allocation4] sm:$0x2] %vm136_vm3, %v411_v48  ;;  %v369_v49 = vpop.permute.xlu1 %368 }
 0x4af   :  { %371 = vst.msk [vmem:[#allocation4] sm:$0x1] %vm133_vm2, %v369_v49 }
 0x4b1   :  { %v594_v5 = vpop.permute.xlu0 %593 }
 0x4b2   :  { %v581_v3 = vpop.permute.xlu1 %580 }
 0x4b6   :  { %v415_v50 = vld [vmem:[#allocation4] sm:$0xff] }
 0x4b7   :  { %798 = vmatmul.mubr.msk.f32.vlgmr.msra.gmra.mxu1 %vm18_vm0, %v415_v50 }
 0x4b8   :  { %812 = vmatpush3.msra.mxu1 %v1003_v23  ;;  %819 = vmatprep.mubr.msk.f32.mxu1 %vm903_vm1, %v902_v1 }
 0x4b9   :  { %813 = vmatprep.subr.mxu1 %v902_v1 }
 0x4ba   :  { %814 = vmatpush3.msra.mxu1 %v1008_v24 }
 0x4bb   :  { %815 = vmatprep.subr.mxu1 %v902_v1 }
 0x4bc   :  { %816 = vmatpush3.msra.mxu1 %v1016_v25 }
 0x4bd   :  { %817 = vmatprep.subr.mxu1 %v902_v1 }
 0x4be   :  { %818 = vmatpush3.msra.mxu1 %v1022_v26 }
 0x577   :  { %v485_v53 = vpop.f32.mrf.mxu1 }
 0x578   :  { %489 = vst [vmem:[#allocation2 + $0x8] sm:$0xff] %v485_v53 }
 0x579   :  { %v799_v23 = vpop.f32.mrf.mxu1 }
 0x57f   :  { %v566_v55 = vld [vmem:[#allocation2 + $0x8] sm:$0x1]  ;;  %v567_v56 = vld [vmem:[#allocation2 + $0x9] sm:$0x1] }
 0x580   :  { %v570_v57 = vadd.f32 %v567_v56, %v566_v55  ;;  %v572_v58 = vadd.f32 %v566_v55, %v563_v54  ;;  %v585_v24 = vadd.f32 %v567_v56, %v563_v54 }
 0x582   :  { %v571_v59 = vadd.f32 %v570_v57, %v563_v54  ;;  %v573_v60 = vsub.f32 0.0, %v572_v58  ;;  %v586_v61 = vsub.f32 0.0, %v585_v24 }
 0x584   :  { %v574_v25 = vmul.f32 1.442695, %v573_v60  ;;  %v587_v62 = vmul.f32 1.442695, %v586_v61  ;;  %864 = vtanh.f32 %v571_v59  ;;  %v598_v10 = vsub.f32 0.0, %v571_v59 }
 0x586   :  { %866 = vpow2.f32 %v574_v25  ;;  %v599_v11 = vmul.f32 1.442695, %v598_v10 }
 0x587   :  { %868 = vpow2.f32 %v587_v62 }
 0x591   :  { %v865_v1 = vpop.eup %864 }
 0x592   :  { %606 = vrot.lane.b32.xlu1 %v865_v1, %s904_s26 }
 0x593   :  { %v867_v26 = vpop.eup %866 }
 0x594   :  { %v869_v63 = vpop.eup %868  ;;  %v576_v0 = vadd.f32 1.0, %v867_v26 }
 0x595   :  { %v589_v6 = vadd.f32 1.0, %v869_v63 }
 0x596   :  { %870 = vrcp.f32 %v576_v0 }
 0x597   :  { %872 = vrcp.f32 %v589_v6 }
 0x598   :  { %874 = vpow2.f32 %v599_v11 }
 0x5a3   :  { %v871_v2 = vpop.eup %870 }
 0x5a4   :  { %v873_v4 = vpop.eup %872  ;;  %v583_v7 = vmul.f32 %v871_v2, %v581_v3 }
 0x5a5   :  { %v596_v8 = vmul.f32 %v873_v4, %v594_v5  ;;  %v875_v12 = vpop.eup %874 }
 0x5a6   :  { %v601_v13 = vadd.f32 1.0, %v875_v12 }
 0x5a7   :  { %v597_v9 = vadd.f32 %v596_v8, %v583_v7 }
 0x5a8   :  { %876 = vrcp.f32 %v601_v13 }
 0x5a9   :  { %611 = vrot.lane.b32.xlu0 %v597_v9, %s905_s3 }
 0x5b5   :  { %v877_v15 = vpop.eup %876 }
 0x604   :  { %v607_v14 = vpop.permute.xlu1 %606 }
 0x605   :  { %v609_v16 = vmul.f32 %v877_v15, %v607_v14 }
 0x61b   :  { %v612_v17 = vpop.permute.xlu0 %611 }
 0x61c   :  { %v614_v18 = vadd.f32 %v612_v17, %v609_v16 }
 0x61e   :  { %878 = vtanh.f32 %v614_v18  ;;  %626 = vst.msk [vmem:[#allocation5] sm:$0x1] %vm133_vm2, %v614_v18 }
 0x62b   :  { %v879_v19 = vpop.eup %878 }
 0x62c   :  { %617 = vrot.lane.b32.xlu1 %v879_v19, %s905_s3 }
 0x69e   :  { %v618_v20 = vpop.permute.xlu1 %617 }
 0x69f   :  { %v620_v21 = vmul.f32 %v877_v15, %v618_v20 }
 0x6a1   :  { %622 = vrot.lane.b32.xlu0 %v620_v21, %s906_s27 }
 0x713   :  { %v623_v22 = vpop.permute.xlu0 %622 }
 0x714   :  { %625 = vst.msk [vmem:[#allocation4] sm:$0x1] %vm133_vm2, %v623_v22  ;;  %627 = vst.msk [vmem:[#allocation6] sm:$0x1] %vm133_vm2, %v623_v22 }
 0x71b   :  { %v628_v27 = vld [vmem:[#allocation4] sm:$0xff] }
 0x71c   :  { %820 = vmatmul.mubr.msk.f32.vlgmr.msra.gmra.mxu1 %vm18_vm0, %v628_v27 }
 0x71d   :  { %891 = shalt.err (!%p888_p4)
}
 0x71e   :  { %714 = dma.vmem_to_hbm [thread:$0]  %s712_s13, 16, %s1105_s4, [#allocation7]  }
 0x7dc   :  { %v698_v28 = vpop.f32.mrf.mxu1 }
 0x7de   :  { %v821_v29 = vpop.f32.mrf.mxu1 }
 0x7df   :  { %900 = dma.done.wait [#allocation7], 16  }
 0x7e0   :  { %901 = vsyncadd [#allocation7], 4294967280 }
 0x7e1   :  { %718 = vsyncpa [#allocation7], 1 }

</bundles_post_ra>
